<compile_context>
chip_gen: v7x
topology: tpu7x:2x2x1
jax: 0.10.0
libtpu: 0.0.40
codegen_flags: <defaults>
</compile_context>

<pallas_src>
import functools

import jax
import jax.numpy as jnp
import numpy as np
from jax.experimental import pallas as pl
from jax.experimental.pallas import tpu as pltpu

LANES = 128            # minor (lane) dim of every tile
MAX_BLOCK_ROWS = 512   # sublane rows per grid step -> 512*128 = 64K px (sweep 512-1024)
SUBLANE_ALIGN = 16     # bf16-output sublane packing (avoids masked vst, esp. on v5e)


def _round_up(x: int, m: int) -> int:
    return (x + m - 1) // m * m


def _make_colormap_255(n_class: int) -> np.ndarray:
    """Deterministic ADE/VOC-style bitwise colormap (reference only). (n_class, 3) ints 0..255."""
    cmap = np.zeros((n_class, 3), dtype=np.int32)
    for i in range(n_class):
        r = g = b = 0
        c = i
        for j in range(8):
            r |= ((c >> 0) & 1) << (7 - j)
            g |= ((c >> 1) & 1) << (7 - j)
            b |= ((c >> 2) & 1) << (7 - j)
            c >>= 3
        cmap[i] = (r, g, b)
    return cmap


def _colormap_kernel(labels_ref, out_ref, *, n_j: int):
    """labels_ref: VMEM (1, R, 128) int32 class ids.
    out_ref:     VMEM (1, 3, R, 128) bfloat16 colors in [0, 1].

    Direct bitwise decode of the ADE/VOC colormap: color-channel-c bit (7-j)
    equals label bit (3j + c).  Fixed ~12*n_j + 9 VPU ops per label vreg,
    independent of n_class; no palette in SMEM/VMEM, no MXU.  The tiny j-loop
    (n_j <= 3 for n_class <= 512) is fully unrolled for LLO visibility."""
    lbl = labels_ref[0, :, :]                      # (R, 128) int32
    r = jnp.zeros_like(lbl)
    g = jnp.zeros_like(lbl)
    b = jnp.zeros_like(lbl)
    for j in range(n_j):                           # statically unrolled
        r = r | (((lbl >> (3 * j + 0)) & 1) << (7 - j))
        g = g | (((lbl >> (3 * j + 1)) & 1) << (7 - j))
        b = b | (((lbl >> (3 * j + 2)) & 1) << (7 - j))

    # One convert + one fused scale per channel (1/255 folded into the multiply).
    inv255 = jnp.float32(1.0 / 255.0)
    out_ref[0, 0, :, :] = (r.astype(jnp.float32) * inv255).astype(out_ref.dtype)
    out_ref[0, 1, :, :] = (g.astype(jnp.float32) * inv255).astype(out_ref.dtype)
    out_ref[0, 2, :, :] = (b.astype(jnp.float32) * inv255).astype(out_ref.dtype)


@functools.partial(jax.jit, static_argnames=("n_j",))
def _apply_colormap(labels_nhw: jax.Array, *, n_j: int) -> jax.Array:
    """labels_nhw: (N, H, W) int -> (N, 3, H, W) bfloat16 colors (NCHW, no transpose)."""
    n, h, w = labels_nhw.shape
    hw = h * w
    rows = pl.cdiv(hw, LANES)                                  # 128-px sublane rows per image
    block_rows = min(MAX_BLOCK_ROWS, _round_up(rows, SUBLANE_ALIGN))
    rows_pad = _round_up(rows, block_rows)
    hw_pad = rows_pad * LANES

    flat = labels_nhw.reshape(n, hw).astype(jnp.int32)
    if hw_pad != hw:
        # Padded pixels (class 0) are sliced off below; no pad/slice at all when
        # H*W already fills whole blocks.
        # TODO(synk): mask the ragged tail in-kernel to drop this extra HBM pass
        # for non-aligned image sizes.
        flat = jnp.pad(flat, ((0, 0), (0, hw_pad - hw)))
    lab = flat.reshape(n, rows_pad, LANES)

    grid = (n, rows_pad // block_rows)
    out = pl.pallas_call(
        functools.partial(_colormap_kernel, n_j=n_j),
        out_shape=jax.ShapeDtypeStruct((n, 3, rows_pad, LANES), jnp.bfloat16),
        grid_spec=pltpu.PrefetchScalarGridSpec(
            num_scalar_prefetch=0,
            grid=grid,
            in_specs=[
                pl.BlockSpec((1, block_rows, LANES), lambda b, i: (b, i, 0)),
            ],
            out_specs=pl.BlockSpec((1, 3, block_rows, LANES), lambda b, i: (b, 0, i, 0)),
        ),
        compiler_params=pltpu.CompilerParams(
            dimension_semantics=("parallel", "parallel")),
    )(lab)

    colors = out.reshape(n, 3, hw_pad)
    if hw_pad != hw:
        colors = colors[:, :, :hw]
    return colors.reshape(n, 3, h, w)


class SegmentationVisualizer:
    """JAX/Pallas port of util/viz.py::SegmentationVisualizer (compute only)."""

    def __init__(self, n_class: int, writer=None):
        self.n_class = n_class
        self.writer = writer
        # Number of colormap bit-groups needed to cover class ids < n_class.
        n_bits = max(1, (max(n_class, 1) - 1).bit_length())
        self.n_j = min(8, -(-n_bits // 3))

    def forward(self, images, target, pred, step=0):
        size = min(6, pred.shape[0])
        images = images[:size]
        pred = pred[:size].astype(jnp.int32)
        target = target[:size].astype(jnp.int32)
        # torch.cat((pred.long(), target.long()), 0) followed by ONE colormap pass:
        # a single pallas_call over the stacked batch halves dispatch/pipeline
        # warm-up cost and keeps the grid wide for v7x's two TensorCores.
        pred_target = jnp.concatenate([pred, target], axis=0)
        colors = _apply_colormap(pred_target, n_j=self.n_j)
        pred_color = colors[:size]
        target_color = colors[size:]
        # TODO(synk): tensorboard writer.add_images calls are host-side, returned instead.
        return images, pred_color, target_color

    __call__ = forward


if __name__ == "__main__":
    key = jax.random.PRNGKey(0)
    k_img, k_pred, k_tgt = jax.random.split(key, 3)

    batch, n_class, H, W = 2, 150, 16, 16          # ADE20K-like class count, small spatial
    images = jax.random.uniform(k_img, (batch, 3, H, W), dtype=jnp.float32)
    pred = jax.random.randint(k_pred, (batch, H, W), 0, n_class, dtype=jnp.int32)
    target = jax.random.randint(k_tgt, (batch, H, W), 0, n_class, dtype=jnp.int32)

    viz = SegmentationVisualizer(n_class)
    imgs_out, pred_color, target_color = viz(images, target, pred, step=0)
    jax.block_until_ready((imgs_out, pred_color, target_color))

    assert pred_color.shape == (batch, 3, H, W)
    assert target_color.shape == (batch, 3, H, W)
    assert pred_color.dtype == jnp.bfloat16

    # Exact check: recover the 0..255 intensity levels from the bf16 colors and
    # compare against a plain palette gather (bf16 quantization of k/255 is under
    # half a level, so rounding recovers k exactly).
    cmap255 = np.asarray(_make_colormap_255(n_class))            # (n_class, 3)

    def ref_levels(lbl):
        return np.transpose(cmap255[np.asarray(lbl)], (0, 3, 1, 2))   # (B, 3, H, W)

    got_pred = np.rint(np.asarray(pred_color.astype(jnp.float32)) * 255.0).astype(np.int64)
    got_tgt = np.rint(np.asarray(target_color.astype(jnp.float32)) * 255.0).astype(np.int64)
    np.testing.assert_array_equal(got_pred, ref_levels(pred))
    np.testing.assert_array_equal(got_tgt, ref_levels(target))

    print("KERNEL_OK")
</pallas_src>

<mosaic_0001>
module attributes {stable_mosaic.version = 11 : i64} {
  func.func @_colormap_kernel(%arg0: i32, %arg1: i32, %arg2: memref<1x16x128xi32, #tpu.memory_space<vmem>>, %arg3: memref<1x3x16x128xbf16, #tpu.memory_space<vmem>>) attributes {dimension_semantics = [#tpu.dimension_semantics<parallel>, #tpu.dimension_semantics<parallel>], iteration_bounds = array<i64: 4, 1>, scalar_prefetch = 0 : i64, scratch_operands = 0 : i64, tpu.core_type = #tpu.core_type<tc>, window_params = [{transform_indices = @transform_0, window_bounds = array<i64: 1, 16, 128>}, {transform_indices = @transform_1, window_bounds = array<i64: 1, 3, 16, 128>}]} {
    %c0 = arith.constant 0 : index
    %c0_0 = arith.constant 0 : index
    %c0_1 = arith.constant 0 : index
    %0 = vector.load %arg2[%c0, %c0_0, %c0_1] : memref<1x16x128xi32, #tpu.memory_space<vmem>>, vector<1x16x128xi32>
    %1 = vector.shape_cast %0 : vector<1x16x128xi32> to vector<16x128xi32>
    %c0_i32 = arith.constant 0 : i32
    %2 = vector.broadcast %c0_i32 : i32 to vector<16x128xi32>
    %c0_i32_2 = arith.constant 0 : i32
    %3 = vector.broadcast %c0_i32_2 : i32 to vector<16x128xi32>
    %c0_i32_3 = arith.constant 0 : i32
    %4 = vector.broadcast %c0_i32_3 : i32 to vector<16x128xi32>
    %c0_i32_4 = arith.constant 0 : i32
    %5 = vector.broadcast %c0_i32_4 : i32 to vector<16x128xi32>
    %6 = arith.shrsi %1, %5 : vector<16x128xi32>
    %c1_i32 = arith.constant 1 : i32
    %7 = vector.broadcast %c1_i32 : i32 to vector<16x128xi32>
    %8 = arith.andi %6, %7 : vector<16x128xi32>
    %c7_i32 = arith.constant 7 : i32
    %9 = vector.broadcast %c7_i32 : i32 to vector<16x128xi32>
    %10 = arith.shli %8, %9 : vector<16x128xi32>
    %11 = arith.ori %2, %10 : vector<16x128xi32>
    %c1_i32_5 = arith.constant 1 : i32
    %12 = vector.broadcast %c1_i32_5 : i32 to vector<16x128xi32>
    %13 = arith.shrsi %1, %12 : vector<16x128xi32>
    %c1_i32_6 = arith.constant 1 : i32
    %14 = vector.broadcast %c1_i32_6 : i32 to vector<16x128xi32>
    %15 = arith.andi %13, %14 : vector<16x128xi32>
    %c7_i32_7 = arith.constant 7 : i32
    %16 = vector.broadcast %c7_i32_7 : i32 to vector<16x128xi32>
    %17 = arith.shli %15, %16 : vector<16x128xi32>
    %18 = arith.ori %3, %17 : vector<16x128xi32>
    %c2_i32 = arith.constant 2 : i32
    %19 = vector.broadcast %c2_i32 : i32 to vector<16x128xi32>
    %20 = arith.shrsi %1, %19 : vector<16x128xi32>
    %c1_i32_8 = arith.constant 1 : i32
    %21 = vector.broadcast %c1_i32_8 : i32 to vector<16x128xi32>
    %22 = arith.andi %20, %21 : vector<16x128xi32>
    %c7_i32_9 = arith.constant 7 : i32
    %23 = vector.broadcast %c7_i32_9 : i32 to vector<16x128xi32>
    %24 = arith.shli %22, %23 : vector<16x128xi32>
    %25 = arith.ori %4, %24 : vector<16x128xi32>
    %c3_i32 = arith.constant 3 : i32
    %26 = vector.broadcast %c3_i32 : i32 to vector<16x128xi32>
    %27 = arith.shrsi %1, %26 : vector<16x128xi32>
    %c1_i32_10 = arith.constant 1 : i32
    %28 = vector.broadcast %c1_i32_10 : i32 to vector<16x128xi32>
    %29 = arith.andi %27, %28 : vector<16x128xi32>
    %c6_i32 = arith.constant 6 : i32
    %30 = vector.broadcast %c6_i32 : i32 to vector<16x128xi32>
    %31 = arith.shli %29, %30 : vector<16x128xi32>
    %32 = arith.ori %11, %31 : vector<16x128xi32>
    %c4_i32 = arith.constant 4 : i32
    %33 = vector.broadcast %c4_i32 : i32 to vector<16x128xi32>
    %34 = arith.shrsi %1, %33 : vector<16x128xi32>
    %c1_i32_11 = arith.constant 1 : i32
    %35 = vector.broadcast %c1_i32_11 : i32 to vector<16x128xi32>
    %36 = arith.andi %34, %35 : vector<16x128xi32>
    %c6_i32_12 = arith.constant 6 : i32
    %37 = vector.broadcast %c6_i32_12 : i32 to vector<16x128xi32>
    %38 = arith.shli %36, %37 : vector<16x128xi32>
    %39 = arith.ori %18, %38 : vector<16x128xi32>
    %c5_i32 = arith.constant 5 : i32
    %40 = vector.broadcast %c5_i32 : i32 to vector<16x128xi32>
    %41 = arith.shrsi %1, %40 : vector<16x128xi32>
    %c1_i32_13 = arith.constant 1 : i32
    %42 = vector.broadcast %c1_i32_13 : i32 to vector<16x128xi32>
    %43 = arith.andi %41, %42 : vector<16x128xi32>
    %c6_i32_14 = arith.constant 6 : i32
    %44 = vector.broadcast %c6_i32_14 : i32 to vector<16x128xi32>
    %45 = arith.shli %43, %44 : vector<16x128xi32>
    %46 = arith.ori %25, %45 : vector<16x128xi32>
    %c6_i32_15 = arith.constant 6 : i32
    %47 = vector.broadcast %c6_i32_15 : i32 to vector<16x128xi32>
    %48 = arith.shrsi %1, %47 : vector<16x128xi32>
    %c1_i32_16 = arith.constant 1 : i32
    %49 = vector.broadcast %c1_i32_16 : i32 to vector<16x128xi32>
    %50 = arith.andi %48, %49 : vector<16x128xi32>
    %c5_i32_17 = arith.constant 5 : i32
    %51 = vector.broadcast %c5_i32_17 : i32 to vector<16x128xi32>
    %52 = arith.shli %50, %51 : vector<16x128xi32>
    %53 = arith.ori %32, %52 : vector<16x128xi32>
    %c7_i32_18 = arith.constant 7 : i32
    %54 = vector.broadcast %c7_i32_18 : i32 to vector<16x128xi32>
    %55 = arith.shrsi %1, %54 : vector<16x128xi32>
    %c1_i32_19 = arith.constant 1 : i32
    %56 = vector.broadcast %c1_i32_19 : i32 to vector<16x128xi32>
    %57 = arith.andi %55, %56 : vector<16x128xi32>
    %c5_i32_20 = arith.constant 5 : i32
    %58 = vector.broadcast %c5_i32_20 : i32 to vector<16x128xi32>
    %59 = arith.shli %57, %58 : vector<16x128xi32>
    %60 = arith.ori %39, %59 : vector<16x128xi32>
    %c8_i32 = arith.constant 8 : i32
    %61 = vector.broadcast %c8_i32 : i32 to vector<16x128xi32>
    %62 = arith.shrsi %1, %61 : vector<16x128xi32>
    %c1_i32_21 = arith.constant 1 : i32
    %63 = vector.broadcast %c1_i32_21 : i32 to vector<16x128xi32>
    %64 = arith.andi %62, %63 : vector<16x128xi32>
    %c5_i32_22 = arith.constant 5 : i32
    %65 = vector.broadcast %c5_i32_22 : i32 to vector<16x128xi32>
    %66 = arith.shli %64, %65 : vector<16x128xi32>
    %67 = arith.ori %46, %66 : vector<16x128xi32>
    %68 = arith.sitofp %53 : vector<16x128xi32> to vector<16x128xf32>
    %cst = arith.constant 0.00392156886 : f32
    %69 = vector.broadcast %cst : f32 to vector<16x128xf32>
    %70 = arith.mulf %68, %69 : vector<16x128xf32>
    %71 = arith.truncf %70 : vector<16x128xf32> to vector<16x128xbf16>
    %c0_23 = arith.constant 0 : index
    %c0_24 = arith.constant 0 : index
    %c0_25 = arith.constant 0 : index
    %c0_26 = arith.constant 0 : index
    %72 = vector.load %arg3[%c0_23, %c0_24, %c0_25, %c0_26] : memref<1x3x16x128xbf16, #tpu.memory_space<vmem>>, vector<1x1x16x128xbf16>
    %73 = vector.shape_cast %72 : vector<1x1x16x128xbf16> to vector<16x128xbf16>
    %74 = vector.shape_cast %71 : vector<16x128xbf16> to vector<1x1x16x128xbf16>
    tpu.vector_store %arg3[%c0_23, %c0_24, %c0_25, %c0_26], %74 {strides = array<i32>} : memref<1x3x16x128xbf16, #tpu.memory_space<vmem>>, vector<1x1x16x128xbf16>,
    %75 = arith.sitofp %60 : vector<16x128xi32> to vector<16x128xf32>
    %cst_27 = arith.constant 0.00392156886 : f32
    %76 = vector.broadcast %cst_27 : f32 to vector<16x128xf32>
    %77 = arith.mulf %75, %76 : vector<16x128xf32>
    %78 = arith.truncf %77 : vector<16x128xf32> to vector<16x128xbf16>
    %c0_28 = arith.constant 0 : index
    %c1 = arith.constant 1 : index
    %c0_29 = arith.constant 0 : index
    %c0_30 = arith.constant 0 : index
    %79 = vector.load %arg3[%c0_28, %c1, %c0_29, %c0_30] : memref<1x3x16x128xbf16, #tpu.memory_space<vmem>>, vector<1x1x16x128xbf16>
    %80 = vector.shape_cast %79 : vector<1x1x16x128xbf16> to vector<16x128xbf16>
    %81 = vector.shape_cast %78 : vector<16x128xbf16> to vector<1x1x16x128xbf16>
    tpu.vector_store %arg3[%c0_28, %c1, %c0_29, %c0_30], %81 {strides = array<i32>} : memref<1x3x16x128xbf16, #tpu.memory_space<vmem>>, vector<1x1x16x128xbf16>,
    %82 = arith.sitofp %67 : vector<16x128xi32> to vector<16x128xf32>
    %cst_31 = arith.constant 0.00392156886 : f32
    %83 = vector.broadcast %cst_31 : f32 to vector<16x128xf32>
    %84 = arith.mulf %82, %83 : vector<16x128xf32>
    %85 = arith.truncf %84 : vector<16x128xf32> to vector<16x128xbf16>
    %c0_32 = arith.constant 0 : index
    %c2 = arith.constant 2 : index
    %c0_33 = arith.constant 0 : index
    %c0_34 = arith.constant 0 : index
    %86 = vector.load %arg3[%c0_32, %c2, %c0_33, %c0_34] : memref<1x3x16x128xbf16, #tpu.memory_space<vmem>>, vector<1x1x16x128xbf16>
    %87 = vector.shape_cast %86 : vector<1x1x16x128xbf16> to vector<16x128xbf16>
    %88 = vector.shape_cast %85 : vector<16x128xbf16> to vector<1x1x16x128xbf16>
    tpu.vector_store %arg3[%c0_32, %c2, %c0_33, %c0_34], %88 {strides = array<i32>} : memref<1x3x16x128xbf16, #tpu.memory_space<vmem>>, vector<1x1x16x128xbf16>,
    return
  }
  func.func @transform_0(%arg0: i32, %arg1: i32) -> (i32, i32, i32) {
    %c0_i32 = arith.constant 0 : i32
    %c0_i32_0 = arith.constant 0 : i32
    return %arg0, %arg1, %c0_i32 : i32, i32, i32
  }
  func.func @transform_1(%arg0: i32, %arg1: i32) -> (i32, i32, i32, i32) {
    %c0_i32 = arith.constant 0 : i32
    %c0_i32_0 = arith.constant 0 : i32
    %c0_i32_1 = arith.constant 0 : i32
    return %arg0, %c0_i32, %arg1, %c0_i32_0 : i32, i32, i32, i32
  }
}

</mosaic_0001>

<bundles_post_ra>
// kernel: _apply_colormap.1
= control target key start
LH: loop header
LB: loop body
LE: loop exit
PB: predicated region body
PF: predicated region fallthrough
CT: control target
= control target key end

     0   :  { %s456_s6 = smov 0   ;;  %s458_s7 = smov 0   ;;  %s520_s0 = inlined_call_operand.vmem [shape: s32[4,16,128], index: 0, kind: input, shape index: {}]   ;;  %s521_s1 = inlined_call_operand.vmem [shape: bf16[4,3,16,128], index: 1, kind: output, shape index: {}]  }
   0x1   :  { %s460_s8 = smov 0  }
   0x2 LB: > { %s23_s9 = sadd.s32 1, %s440_s7  ;;  %p357_p0 = scmp.ge.s32.totalorder %s444_s8, 1  ;;  %s444_s8 = sphi %s460_s8, %s11_s8   ;;  %s440_s7 = sphi %s458_s7, %s523_s7   ;;  %s436_s6 = sphi %s456_s6, %s522_s6  }
   0x3   : > { %p25_p1 = scmp.ge.s32.totalorder %s23_s9, 4  ;;  %p108_p2 = scmp.lt.s32.totalorder %s444_s8, 5 }
   0x5   : > { %s525_s9 = smov (%p25_p1, %s23_s9), 0  ;;  %p109_p3 = pnand %p357_p0, %p108_p2 }
   0x6   : > { %p137_p4 = scmp.lt.s32.totalorder (!%p109_p3), %s436_s6, 3 }
   0x7   : > { %112 = sbr.rel (%p109_p3) target bundleno = 47 (0x2f), region = 24 }
   0xe   : > { %s527_s6 = smov (!%p137_p4, %s436_s6), 3 }
   0xf   : > { %s373_s10 = sshll.u32 %s527_s6, 4  ;;  %s397_s14 = smul.u32 24, %s527_s6 }
  0x10   : > { %s144_s13 = scalar_lea.vmem %s520_s0, %s373_s10 }
  0x11   : > { %v480_v0 = vld [vmem:[%s144_s13] sm:$0xff]  ;;  %v482_v1 = vld [vmem:[%s144_s13 + $0x8] sm:$0xff]  ;;  %s504_s17 = scalar_lea.vmem %s521_s1, %s397_s14 }
  0x12   : > { %v158_v2 = vand.u32 1, %v480_v0  ;;  %v159_v3 = vand.u32 1, %v482_v1  ;;  %v174_v4 = vshra.s32 %v480_v0, 3  ;;  %v175_v5 = vshra.s32 %v482_v1, 3 }
  0x13   : > { %v198_v6 = vshra.s32 %v480_v0, 6  ;;  %v199_v7 = vshra.s32 %v482_v1, 6  ;;  %v162_v8 = vshra.s32 %v480_v0, 1  ;;  %v163_v9 = vshra.s32 %v482_v1, 1 }
  0x14   : > { %v160_v10 = vshll.u32 %v158_v2, 7  ;;  %v161_v11 = vshll.u32 %v159_v3, 7  ;;  %v176_v12 = vand.u32 1, %v174_v4  ;;  %v177_v13 = vand.u32 1, %v175_v5 }
  0x15   : > { %v200_v14 = vand.u32 1, %v198_v6  ;;  %v201_v15 = vand.u32 1, %v199_v7  ;;  %v164_v16 = vand.u32 1, %v162_v8  ;;  %v165_v17 = vand.u32 1, %v163_v9 }
  0x16   : > { %v178_v18 = vshll.u32 %v176_v12, 6  ;;  %v179_v19 = vshll.u32 %v177_v13, 6  ;;  %v182_v20 = vshra.s32 %v480_v0, 4  ;;  %v183_v21 = vshra.s32 %v482_v1, 4 }
  0x17   : > { %v202_v22 = vshll.u32 %v200_v14, 5  ;;  %v203_v23 = vshll.u32 %v201_v15, 5  ;;  %v166_v24 = vshll.u32 %v164_v16, 7  ;;  %v167_v25 = vshll.u32 %v165_v17, 7 }
  0x18   : > { %v180_v26 = vor.u32 %v178_v18, %v160_v10  ;;  %v181_v27 = vor.u32 %v179_v19, %v161_v11  ;;  %v184_v28 = vand.u32 1, %v182_v20  ;;  %v185_v29 = vand.u32 1, %v183_v21 }
  0x19   : > { %v206_v30 = vshra.s32 %v480_v0, 7  ;;  %v207_v31 = vshra.s32 %v482_v1, 7  ;;  %v168_v32 = vshra.s32 %v480_v0, 2  ;;  %v169_v33 = vshra.s32 %v482_v1, 2 }
  0x1a   : > { %v204_v34 = vor.u32 %v202_v22, %v180_v26  ;;  %v205_v35 = vor.u32 %v203_v23, %v181_v27  ;;  %v186_v36 = vshll.u32 %v184_v28, 6  ;;  %v187_v37 = vshll.u32 %v185_v29, 6 }
  0x1b   : > { %v208_v38 = vand.u32 1, %v206_v30  ;;  %v209_v39 = vand.u32 1, %v207_v31  ;;  %v170_v40 = vand.u32 1, %v168_v32  ;;  %v171_v41 = vand.u32 1, %v169_v33 }
  0x1c   : > { %v222_v42 = vcvt.s32.f32 %v204_v34  ;;  %v223_v43 = vcvt.s32.f32 %v205_v35  ;;  %v188_v44 = vor.u32 %v186_v36, %v166_v24  ;;  %v189_v45 = vor.u32 %v187_v37, %v167_v25 }
  0x1d   : > { %v210_v46 = vshll.u32 %v208_v38, 5  ;;  %v211_v47 = vshll.u32 %v209_v39, 5  ;;  %v172_v48 = vshll.u32 %v170_v40, 7  ;;  %v190_v51 = vshra.s32 %v480_v0, 5 }
  0x1e   : > { %v224_v49 = vmul.f32 0.003921569, %v222_v42  ;;  %v225_v50 = vmul.f32 0.003921569, %v223_v43  ;;  %v191_v52 = vshra.s32 %v482_v1, 5  ;;  %v214_v55 = vshra.s32 %v480_v0, 8 }
  0x1f   : > { %v212_v53 = vor.u32 %v210_v46, %v188_v44  ;;  %v213_v54 = vor.u32 %v211_v47, %v189_v45  ;;  %v215_v56 = vshra.s32 %v482_v1, 8  ;;  %v173_v58 = vshll.u32 %v171_v41, 7 }
  0x20   : > { %v383_v57 = vpack.c.bf16 %v225_v50, %v224_v49  ;;  %v192_v59 = vand.u32 1, %v190_v51  ;;  %v193_v60 = vand.u32 1, %v191_v52  ;;  %v216_v63 = vand.u32 1, %v214_v55 }
  0x21   : > { %v236_v61 = vcvt.s32.f32 %v212_v53  ;;  %v237_v62 = vcvt.s32.f32 %v213_v54  ;;  %v217_v2 = vand.u32 1, %v215_v56 }
  0x22   : > { %384 = vst [vmem:[%s504_s17] sm:$0xff] %v383_v57   ;;  %v194_v3 = vshll.u32 %v192_v59, 6  ;;  %v195_v4 = vshll.u32 %v193_v60, 6  ;;  %v218_v7 = vshll.u32 %v216_v63, 5 }
  0x23   : > { %v238_v5 = vmul.f32 0.003921569, %v236_v61  ;;  %v239_v6 = vmul.f32 0.003921569, %v237_v62  ;;  %v219_v8 = vshll.u32 %v217_v2, 5 }
  0x24   : > { %v196_v0 = vor.u32 %v194_v3, %v172_v48  ;;  %v197_v9 = vor.u32 %v195_v4, %v173_v58 }
  0x25   : > { %v388_v1 = vpack.c.bf16 %v239_v6, %v238_v5 }
  0x26   : > { %v220_v10 = vor.u32 %v218_v7, %v196_v0  ;;  %v221_v11 = vor.u32 %v219_v8, %v197_v9 }
  0x27   : > { %395 = vst [vmem:[%s504_s17 + $0x8] sm:$0xff] %v388_v1  }
  0x28   : > { %v251_v12 = vcvt.s32.f32 %v220_v10  ;;  %v252_v13 = vcvt.s32.f32 %v221_v11 }
  0x2a   : > { %v253_v14 = vmul.f32 0.003921569, %v251_v12  ;;  %v254_v15 = vmul.f32 0.003921569, %v252_v13 }
  0x2c   : > { %v393_v16 = vpack.c.bf16 %v254_v15, %v253_v14 }
  0x2e   : > { %396 = vst [vmem:[%s504_s17 + $0x10] sm:$0xff] %v393_v16  }
  0x2f PF: > { %s11_s8 = sadd.s32 1, %s444_s8   ;;  %s522_s6 = smov %s440_s7 }
  0x30   : > { %p8_p5 = scmp.ge.s32.totalorder %s11_s8, 6   ;;  %s523_s7 = smov %s525_s9 }
  0x32   :  { %10 = sbr.rel (!%p8_p5) target bundleno = 2 (0x2), region = 56 }

</bundles_post_ra>
